<compile_context>
chip_gen: v7x
topology: tpu7x:2x2x1
jax: 0.10.0
libtpu: 0.0.40
codegen_flags: <defaults>
</compile_context>

<pallas_src>
import functools

import jax
import jax.numpy as jnp
from jax import lax
from jax.experimental import pallas as pl
from jax.experimental.pallas import tpu as pltpu


def _mha_kernel(x_ref, wqkv_ref, bqkv_ref, wout_ref, bout_ref, o_ref, ctx_ref,
                *, n_heads: int, head_dim: int, emb_dim: int):
    """One grid step = one block of `block_b` batch elements.

    x_ref:    (block_b, S, E)
    wqkv_ref: (E, 3E)   columns pre-permuted to [Q_heads | K_heads | V_heads]
    bqkv_ref: (1, 3E)   same permutation
    wout_ref: (E, E)
    bout_ref: (1, E)
    o_ref:    (block_b, S, E)
    ctx_ref:  VMEM scratch (block_b, S, E) f32 -- per-head context accumulator
    """
    block_b, seq, _ = x_ref.shape
    rows = block_b * seq
    E = emb_dim

    # ---- QKV projection: one big (rows, E) @ (E, 3E) MXU matmul. ------------
    x2d = x_ref[...].reshape(rows, E)
    qkv = jnp.dot(x2d, wqkv_ref[...], preferred_element_type=jnp.float32)
    qkv = qkv + bqkv_ref[...]                                    # (rows, 3E)

    # Module divides scores by emb_dim**-0.5  ==> multiply by sqrt(emb_dim).
    # Fold the scale into Q (rows*E elems) instead of the (S,S) scores.
    inv_scale = float(emb_dim) ** 0.5
    q_blk = qkv[:, :E] * inv_scale                               # (rows, E)
    k_blk = qkv[:, E:2 * E]
    v_blk = qkv[:, 2 * E:]

    # ---- Per-head attention (H is small & static). ---------------------------
    for h in range(n_heads):
        lo, hi = h * head_dim, (h + 1) * head_dim
        q = q_blk[:, lo:hi].reshape(block_b, seq, head_dim)
        k = k_blk[:, lo:hi].reshape(block_b, seq, head_dim)
        v = v_blk[:, lo:hi].reshape(block_b, seq, head_dim)

        # q @ k^T without materializing a transposed copy: contract the last
        # dims directly on the MXU (batch dim = 0).
        s = lax.dot_general(
            q, k,
            dimension_numbers=(((2,), (2,)), ((0,), (0,))),
            preferred_element_type=jnp.float32)                  # (block_b,S,S)

        # softmax #1 (with max subtraction).
        m = jnp.max(s, axis=-1, keepdims=True)
        e = jnp.exp(s - m)
        a = e * pl.reciprocal(jnp.sum(e, axis=-1, keepdims=True), approx=False)

        # softmax #2 (as in the reference module). Inputs are probabilities in
        # [0,1] so the max subtraction is skipped (mathematically identical;
        # saves one XLU row-reduce per head). Exact reciprocal keeps the
        # 1e-5-level match with the reference; approx=True is an option when
        # the tolerance allows.
        e2 = jnp.exp(a)
        a2 = e2 * pl.reciprocal(jnp.sum(e2, axis=-1, keepdims=True),
                                approx=False)
        # TODO(synk): attention dropout (training mode, attn_dropout > 0) not
        # implemented; this is the eval-mode identity path.

        ctx_h = lax.dot_general(
            a2, v,
            dimension_numbers=(((2,), (1,)), ((0,), (0,))),
            preferred_element_type=jnp.float32)                  # (block_b,S,hd)

        # Write straight into the VMEM context accumulator (no head-concat).
        ctx_ref[:, :, lo:hi] = ctx_h

    # ---- Output projection. ---------------------------------------------------
    ctx2d = ctx_ref[...].reshape(rows, E)
    out = jnp.dot(ctx2d, wout_ref[...], preferred_element_type=jnp.float32)
    out = out + bout_ref[...]
    o_ref[...] = out.reshape(block_b, seq, E).astype(o_ref.dtype)


def _permute_qkv_columns(w_qkv, b_qkv, n_heads, head_dim):
    """Reorder W_qkv / b_qkv output columns from the module's per-head
    [q|k|v] interleaving to a global [all-Q | all-K | all-V] layout (heads
    contiguous inside each region). Pure column permutation => the projection
    output values are bitwise identical, just reordered."""
    e3 = 3 * n_heads * head_dim
    perm = jnp.arange(e3).reshape(n_heads, 3, head_dim)
    perm = perm.transpose(1, 0, 2).reshape(-1)
    return w_qkv[:, perm], b_qkv[:, perm]


def _pick_block_b(batch: int, seq: int) -> int:
    """Choose how many batch elements to fuse per grid step: fill >=256 MXU
    rows when possible while keeping the grid non-trivial and capping per-step
    rows (VMEM) at 1024."""
    divisors = [d for d in range(1, batch + 1) if batch % d == 0]
    for d in divisors:                     # smallest block reaching 256 rows
        if d * seq >= 256:
            return d
    best = 1
    for d in divisors:                     # else the biggest block under the cap
        if d * seq <= 1024:
            best = d
    return best


def multihead_attention(x, w_qkv, b_qkv, w_out, b_out, n_heads: int):
    B, S, E = x.shape
    assert E % n_heads == 0
    head_dim = E // n_heads

    # One-time weight prep outside the kernel (constant-folds under jit when
    # the weights are parameters).
    w_qkv_p, b_qkv_p = _permute_qkv_columns(w_qkv, b_qkv, n_heads, head_dim)

    block_b = _pick_block_b(B, S)
    grid = (B // block_b,)

    kernel = functools.partial(
        _mha_kernel, n_heads=n_heads, head_dim=head_dim, emb_dim=E)

    return pl.pallas_call(
        kernel,
        out_shape=jax.ShapeDtypeStruct((B, S, E), x.dtype),
        grid_spec=pltpu.PrefetchScalarGridSpec(
            num_scalar_prefetch=0,
            grid=grid,
            in_specs=[
                pl.BlockSpec((block_b, S, E), lambda b: (b, 0, 0)),   # x
                pl.BlockSpec((E, 3 * E), lambda b: (0, 0)),           # W_qkv (perm)
                pl.BlockSpec((1, 3 * E), lambda b: (0, 0)),           # b_qkv (perm)
                pl.BlockSpec((E, E), lambda b: (0, 0)),               # W_out
                pl.BlockSpec((1, E), lambda b: (0, 0)),               # b_out
            ],
            out_specs=pl.BlockSpec((block_b, S, E), lambda b: (b, 0, 0)),
            scratch_shapes=[pltpu.VMEM((block_b, S, E), jnp.float32)],
        ),
        compiler_params=pltpu.CompilerParams(
            dimension_semantics=("parallel",)),
    )(x, w_qkv_p, b_qkv_p, w_out, b_out)


def _reference(x, w_qkv, b_qkv, w_out, b_out, n_heads):
    """Pure-JAX replica of the PyTorch forward (for validation)."""
    B, S, E = x.shape
    hd = E // n_heads
    qkv = x @ w_qkv + b_qkv[0]                           # (B, S, 3E)
    qkv = qkv.reshape(B, S, n_heads, 3 * hd).transpose(0, 2, 1, 3)
    q, k, v = jnp.split(qkv, 3, axis=-1)
    scale = E ** (-0.5)
    scores = (q @ jnp.swapaxes(k, -2, -1)) / scale
    attn = jax.nn.softmax(scores, axis=-1)
    attn = jax.nn.softmax(attn, axis=-1)
    ctx = attn @ v                                       # (B, H, S, hd)
    ctx = ctx.transpose(0, 2, 1, 3).reshape(B, S, E)
    return ctx @ w_out + b_out[0]


if __name__ == "__main__":
    # Small shapes consistent with the module: batch=2, seq=8, emb_dim=32, heads=4.
    B, S, E, H = 2, 8, 32, 4

    key = jax.random.PRNGKey(0)
    kx, k1, k2, k3, k4 = jax.random.split(key, 5)

    # Deterministic parameter init (uniform, nn.Linear-style bound 1/sqrt(fan_in)).
    bound = 1.0 / (E ** 0.5)
    x = jax.random.normal(kx, (B, S, E), dtype=jnp.float32)
    w_qkv = jax.random.uniform(k1, (E, 3 * E), jnp.float32, -bound, bound)
    b_qkv = jax.random.uniform(k2, (1, 3 * E), jnp.float32, -bound, bound)
    w_out = jax.random.uniform(k3, (E, E), jnp.float32, -bound, bound)
    b_out = jax.random.uniform(k4, (1, E), jnp.float32, -bound, bound)

    out = multihead_attention(x, w_qkv, b_qkv, w_out, b_out, n_heads=H)
    out = jax.block_until_ready(out)

    ref = _reference(x, w_qkv, b_qkv, w_out, b_out, n_heads=H)
    assert out.shape == (B, S, E)
    max_err = float(jnp.max(jnp.abs(out - ref)))
    assert jnp.allclose(out, ref, atol=2e-5, rtol=2e-5), max_err

    print("KERNEL_OK")
</pallas_src>

<mosaic_0001>
module attributes {stable_mosaic.version = 11 : i64} {
  func.func @_mha_kernel(%arg0: i32, %arg1: memref<2x8x32xf32, #tpu.memory_space<vmem>>, %arg2: memref<32x96xf32, #tpu.memory_space<vmem>>, %arg3: memref<1x96xf32, #tpu.memory_space<vmem>>, %arg4: memref<32x32xf32, #tpu.memory_space<vmem>>, %arg5: memref<1x32xf32, #tpu.memory_space<vmem>>, %arg6: memref<2x8x32xf32, #tpu.memory_space<vmem>>, %arg7: memref<2x8x32xf32, #tpu.memory_space<vmem>>) attributes {dimension_semantics = [#tpu.dimension_semantics<parallel>], iteration_bounds = array<i64: 1>, scalar_prefetch = 0 : i64, scratch_operands = 1 : i64, tpu.core_type = #tpu.core_type<tc>, window_params = [{transform_indices = @transform_0, window_bounds = array<i64: 2, 8, 32>}, {pipeline_mode = #tpu.pipeline_mode<synchronous>, transform_indices = @transform_1, window_bounds = array<i64: 32, 96>}, {pipeline_mode = #tpu.pipeline_mode<synchronous>, transform_indices = @transform_2, window_bounds = array<i64: 1, 96>}, {pipeline_mode = #tpu.pipeline_mode<synchronous>, transform_indices = @transform_3, window_bounds = array<i64: 32, 32>}, {pipeline_mode = #tpu.pipeline_mode<synchronous>, transform_indices = @transform_4, window_bounds = array<i64: 1, 32>}, {transform_indices = @transform_5, window_bounds = array<i64: 2, 8, 32>}]} {
    %c0 = arith.constant 0 : index
    %c0_0 = arith.constant 0 : index
    %c0_1 = arith.constant 0 : index
    %0 = vector.load %arg1[%c0, %c0_0, %c0_1] : memref<2x8x32xf32, #tpu.memory_space<vmem>>, vector<2x8x32xf32>
    %1 = vector.shape_cast %0 : vector<2x8x32xf32> to vector<16x32xf32>
    %c0_2 = arith.constant 0 : index
    %c0_3 = arith.constant 0 : index
    %2 = vector.load %arg2[%c0_2, %c0_3] : memref<32x96xf32, #tpu.memory_space<vmem>>, vector<32x96xf32>
    %cst = arith.constant dense<0.000000e+00> : vector<16x96xf32>
    %3 = tpu.matmul %1, %2, %cst {dimension_numbers = #tpu.dot_dimension_numbers<[1], [0], [0], [1], [0, 0, 1, 1], [], []>} : vector<16x32xf32>, vector<32x96xf32>, vector<16x96xf32> -> vector<16x96xf32>
    %c0_4 = arith.constant 0 : index
    %c0_5 = arith.constant 0 : index
    %4 = vector.load %arg3[%c0_4, %c0_5] : memref<1x96xf32, #tpu.memory_space<vmem>>, vector<1x96xf32>
    %5 = vector.broadcast %4 : vector<1x96xf32> to vector<16x96xf32>
    %6 = arith.addf %3, %5 : vector<16x96xf32>
    %7 = vector.extract_strided_slice %6 {offsets = [0, 0], sizes = [16, 32], strides = [1, 1]} : vector<16x96xf32> to vector<16x32xf32>
    %cst_6 = arith.constant 5.65685415 : f32
    %8 = vector.broadcast %cst_6 : f32 to vector<16x32xf32>
    %9 = arith.mulf %7, %8 : vector<16x32xf32>
    %10 = vector.extract_strided_slice %6 {offsets = [0, 32], sizes = [16, 32], strides = [1, 1]} : vector<16x96xf32> to vector<16x32xf32>
    %11 = vector.extract_strided_slice %6 {offsets = [0, 64], sizes = [16, 32], strides = [1, 1]} : vector<16x96xf32> to vector<16x32xf32>
    %12 = vector.extract_strided_slice %9 {offsets = [0, 0], sizes = [16, 8], strides = [1, 1]} : vector<16x32xf32> to vector<16x8xf32>
    %13 = vector.shape_cast %12 : vector<16x8xf32> to vector<2x8x8xf32>
    %14 = vector.extract_strided_slice %10 {offsets = [0, 0], sizes = [16, 8], strides = [1, 1]} : vector<16x32xf32> to vector<16x8xf32>
    %15 = vector.shape_cast %14 : vector<16x8xf32> to vector<2x8x8xf32>
    %16 = vector.extract_strided_slice %11 {offsets = [0, 0], sizes = [16, 8], strides = [1, 1]} : vector<16x32xf32> to vector<16x8xf32>
    %17 = vector.shape_cast %16 : vector<16x8xf32> to vector<2x8x8xf32>
    %cst_7 = arith.constant dense<0.000000e+00> : vector<2x8x8xf32>
    %18 = tpu.matmul %13, %15, %cst_7 {dimension_numbers = #tpu.dot_dimension_numbers<[2], [2], [1], [1], [0, 0, 0, 1, 1, 1], [0], [0]>} : vector<2x8x8xf32>, vector<2x8x8xf32>, vector<2x8x8xf32> -> vector<2x8x8xf32>
    %cst_8 = arith.constant dense<0xFF800000> : vector<2x8xf32>
    %19 = vector.multi_reduction <maximumf>, %18, %cst_8 [2] : vector<2x8x8xf32> to vector<2x8xf32>
    %20 = vector.shape_cast %19 : vector<2x8xf32> to vector<2x8x1xf32>
    %21 = vector.broadcast %20 : vector<2x8x1xf32> to vector<2x8x8xf32>
    %22 = arith.subf %18, %21 : vector<2x8x8xf32>
    %23 = math.exp %22 : vector<2x8x8xf32>
    %cst_9 = arith.constant dense<0.000000e+00> : vector<2x8xf32>
    %24 = vector.multi_reduction <add>, %23, %cst_9 [2] : vector<2x8x8xf32> to vector<2x8xf32>
    %25 = vector.shape_cast %24 : vector<2x8xf32> to vector<2x8x1xf32>
    %26 = tpu.reciprocal %25 : vector<2x8x1xf32> -> vector<2x8x1xf32>
    %27 = vector.broadcast %26 : vector<2x8x1xf32> to vector<2x8x8xf32>
    %28 = arith.mulf %23, %27 : vector<2x8x8xf32>
    %29 = math.exp %28 : vector<2x8x8xf32>
    %cst_10 = arith.constant dense<0.000000e+00> : vector<2x8xf32>
    %30 = vector.multi_reduction <add>, %29, %cst_10 [2] : vector<2x8x8xf32> to vector<2x8xf32>
    %31 = vector.shape_cast %30 : vector<2x8xf32> to vector<2x8x1xf32>
    %32 = tpu.reciprocal %31 : vector<2x8x1xf32> -> vector<2x8x1xf32>
    %33 = vector.broadcast %32 : vector<2x8x1xf32> to vector<2x8x8xf32>
    %34 = arith.mulf %29, %33 : vector<2x8x8xf32>
    %cst_11 = arith.constant dense<0.000000e+00> : vector<2x8x8xf32>
    %35 = tpu.matmul %34, %17, %cst_11 {dimension_numbers = #tpu.dot_dimension_numbers<[2], [1], [1], [2], [0, 0, 0, 1, 1, 2], [0], [0]>} : vector<2x8x8xf32>, vector<2x8x8xf32>, vector<2x8x8xf32> -> vector<2x8x8xf32>
    %c0_12 = arith.constant 0 : index
    %c0_13 = arith.constant 0 : index
    %c0_14 = arith.constant 0 : index
    %36 = vector.load %arg7[%c0_12, %c0_13, %c0_14] : memref<2x8x32xf32, #tpu.memory_space<vmem>>, vector<2x8x8xf32>
    tpu.vector_store %arg7[%c0_12, %c0_13, %c0_14], %35 {strides = array<i32>} : memref<2x8x32xf32, #tpu.memory_space<vmem>>, vector<2x8x8xf32>,
    %37 = vector.extract_strided_slice %9 {offsets = [0, 8], sizes = [16, 8], strides = [1, 1]} : vector<16x32xf32> to vector<16x8xf32>
    %38 = vector.shape_cast %37 : vector<16x8xf32> to vector<2x8x8xf32>
    %39 = vector.extract_strided_slice %10 {offsets = [0, 8], sizes = [16, 8], strides = [1, 1]} : vector<16x32xf32> to vector<16x8xf32>
    %40 = vector.shape_cast %39 : vector<16x8xf32> to vector<2x8x8xf32>
    %41 = vector.extract_strided_slice %11 {offsets = [0, 8], sizes = [16, 8], strides = [1, 1]} : vector<16x32xf32> to vector<16x8xf32>
    %42 = vector.shape_cast %41 : vector<16x8xf32> to vector<2x8x8xf32>
    %cst_15 = arith.constant dense<0.000000e+00> : vector<2x8x8xf32>
    %43 = tpu.matmul %38, %40, %cst_15 {dimension_numbers = #tpu.dot_dimension_numbers<[2], [2], [1], [1], [0, 0, 0, 1, 1, 1], [0], [0]>} : vector<2x8x8xf32>, vector<2x8x8xf32>, vector<2x8x8xf32> -> vector<2x8x8xf32>
    %cst_16 = arith.constant dense<0xFF800000> : vector<2x8xf32>
    %44 = vector.multi_reduction <maximumf>, %43, %cst_16 [2] : vector<2x8x8xf32> to vector<2x8xf32>
    %45 = vector.shape_cast %44 : vector<2x8xf32> to vector<2x8x1xf32>
    %46 = vector.broadcast %45 : vector<2x8x1xf32> to vector<2x8x8xf32>
    %47 = arith.subf %43, %46 : vector<2x8x8xf32>
    %48 = math.exp %47 : vector<2x8x8xf32>
    %cst_17 = arith.constant dense<0.000000e+00> : vector<2x8xf32>
    %49 = vector.multi_reduction <add>, %48, %cst_17 [2] : vector<2x8x8xf32> to vector<2x8xf32>
    %50 = vector.shape_cast %49 : vector<2x8xf32> to vector<2x8x1xf32>
    %51 = tpu.reciprocal %50 : vector<2x8x1xf32> -> vector<2x8x1xf32>
    %52 = vector.broadcast %51 : vector<2x8x1xf32> to vector<2x8x8xf32>
    %53 = arith.mulf %48, %52 : vector<2x8x8xf32>
    %54 = math.exp %53 : vector<2x8x8xf32>
    %cst_18 = arith.constant dense<0.000000e+00> : vector<2x8xf32>
    %55 = vector.multi_reduction <add>, %54, %cst_18 [2] : vector<2x8x8xf32> to vector<2x8xf32>
    %56 = vector.shape_cast %55 : vector<2x8xf32> to vector<2x8x1xf32>
    %57 = tpu.reciprocal %56 : vector<2x8x1xf32> -> vector<2x8x1xf32>
    %58 = vector.broadcast %57 : vector<2x8x1xf32> to vector<2x8x8xf32>
    %59 = arith.mulf %54, %58 : vector<2x8x8xf32>
    %cst_19 = arith.constant dense<0.000000e+00> : vector<2x8x8xf32>
    %60 = tpu.matmul %59, %42, %cst_19 {dimension_numbers = #tpu.dot_dimension_numbers<[2], [1], [1], [2], [0, 0, 0, 1, 1, 2], [0], [0]>} : vector<2x8x8xf32>, vector<2x8x8xf32>, vector<2x8x8xf32> -> vector<2x8x8xf32>
    %c0_20 = arith.constant 0 : index
    %c0_21 = arith.constant 0 : index
    %c8 = arith.constant 8 : index
    %61 = vector.load %arg7[%c0_20, %c0_21, %c8] : memref<2x8x32xf32, #tpu.memory_space<vmem>>, vector<2x8x8xf32>
    tpu.vector_store %arg7[%c0_20, %c0_21, %c8], %60 {strides = array<i32>} : memref<2x8x32xf32, #tpu.memory_space<vmem>>, vector<2x8x8xf32>,
    %62 = vector.extract_strided_slice %9 {offsets = [0, 16], sizes = [16, 8], strides = [1, 1]} : vector<16x32xf32> to vector<16x8xf32>
    %63 = vector.shape_cast %62 : vector<16x8xf32> to vector<2x8x8xf32>
    %64 = vector.extract_strided_slice %10 {offsets = [0, 16], sizes = [16, 8], strides = [1, 1]} : vector<16x32xf32> to vector<16x8xf32>
    %65 = vector.shape_cast %64 : vector<16x8xf32> to vector<2x8x8xf32>
    %66 = vector.extract_strided_slice %11 {offsets = [0, 16], sizes = [16, 8], strides = [1, 1]} : vector<16x32xf32> to vector<16x8xf32>
    %67 = vector.shape_cast %66 : vector<16x8xf32> to vector<2x8x8xf32>
    %cst_22 = arith.constant dense<0.000000e+00> : vector<2x8x8xf32>
    %68 = tpu.matmul %63, %65, %cst_22 {dimension_numbers = #tpu.dot_dimension_numbers<[2], [2], [1], [1], [0, 0, 0, 1, 1, 1], [0], [0]>} : vector<2x8x8xf32>, vector<2x8x8xf32>, vector<2x8x8xf32> -> vector<2x8x8xf32>
    %cst_23 = arith.constant dense<0xFF800000> : vector<2x8xf32>
    %69 = vector.multi_reduction <maximumf>, %68, %cst_23 [2] : vector<2x8x8xf32> to vector<2x8xf32>
    %70 = vector.shape_cast %69 : vector<2x8xf32> to vector<2x8x1xf32>
    %71 = vector.broadcast %70 : vector<2x8x1xf32> to vector<2x8x8xf32>
    %72 = arith.subf %68, %71 : vector<2x8x8xf32>
    %73 = math.exp %72 : vector<2x8x8xf32>
    %cst_24 = arith.constant dense<0.000000e+00> : vector<2x8xf32>
    %74 = vector.multi_reduction <add>, %73, %cst_24 [2] : vector<2x8x8xf32> to vector<2x8xf32>
    %75 = vector.shape_cast %74 : vector<2x8xf32> to vector<2x8x1xf32>
    %76 = tpu.reciprocal %75 : vector<2x8x1xf32> -> vector<2x8x1xf32>
    %77 = vector.broadcast %76 : vector<2x8x1xf32> to vector<2x8x8xf32>
    %78 = arith.mulf %73, %77 : vector<2x8x8xf32>
    %79 = math.exp %78 : vector<2x8x8xf32>
    %cst_25 = arith.constant dense<0.000000e+00> : vector<2x8xf32>
    %80 = vector.multi_reduction <add>, %79, %cst_25 [2] : vector<2x8x8xf32> to vector<2x8xf32>
    %81 = vector.shape_cast %80 : vector<2x8xf32> to vector<2x8x1xf32>
    %82 = tpu.reciprocal %81 : vector<2x8x1xf32> -> vector<2x8x1xf32>
    %83 = vector.broadcast %82 : vector<2x8x1xf32> to vector<2x8x8xf32>
    %84 = arith.mulf %79, %83 : vector<2x8x8xf32>
    %cst_26 = arith.constant dense<0.000000e+00> : vector<2x8x8xf32>
    %85 = tpu.matmul %84, %67, %cst_26 {dimension_numbers = #tpu.dot_dimension_numbers<[2], [1], [1], [2], [0, 0, 0, 1, 1, 2], [0], [0]>} : vector<2x8x8xf32>, vector<2x8x8xf32>, vector<2x8x8xf32> -> vector<2x8x8xf32>
    %c0_27 = arith.constant 0 : index
    %c0_28 = arith.constant 0 : index
    %c16 = arith.constant 16 : index
    %86 = vector.load %arg7[%c0_27, %c0_28, %c16] : memref<2x8x32xf32, #tpu.memory_space<vmem>>, vector<2x8x8xf32>
    tpu.vector_store %arg7[%c0_27, %c0_28, %c16], %85 {strides = array<i32>} : memref<2x8x32xf32, #tpu.memory_space<vmem>>, vector<2x8x8xf32>,
    %87 = vector.extract_strided_slice %9 {offsets = [0, 24], sizes = [16, 8], strides = [1, 1]} : vector<16x32xf32> to vector<16x8xf32>
    %88 = vector.shape_cast %87 : vector<16x8xf32> to vector<2x8x8xf32>
    %89 = vector.extract_strided_slice %10 {offsets = [0, 24], sizes = [16, 8], strides = [1, 1]} : vector<16x32xf32> to vector<16x8xf32>
    %90 = vector.shape_cast %89 : vector<16x8xf32> to vector<2x8x8xf32>
    %91 = vector.extract_strided_slice %11 {offsets = [0, 24], sizes = [16, 8], strides = [1, 1]} : vector<16x32xf32> to vector<16x8xf32>
    %92 = vector.shape_cast %91 : vector<16x8xf32> to vector<2x8x8xf32>
    %cst_29 = arith.constant dense<0.000000e+00> : vector<2x8x8xf32>
    %93 = tpu.matmul %88, %90, %cst_29 {dimension_numbers = #tpu.dot_dimension_numbers<[2], [2], [1], [1], [0, 0, 0, 1, 1, 1], [0], [0]>} : vector<2x8x8xf32>, vector<2x8x8xf32>, vector<2x8x8xf32> -> vector<2x8x8xf32>
    %cst_30 = arith.constant dense<0xFF800000> : vector<2x8xf32>
    %94 = vector.multi_reduction <maximumf>, %93, %cst_30 [2] : vector<2x8x8xf32> to vector<2x8xf32>
    %95 = vector.shape_cast %94 : vector<2x8xf32> to vector<2x8x1xf32>
    %96 = vector.broadcast %95 : vector<2x8x1xf32> to vector<2x8x8xf32>
    %97 = arith.subf %93, %96 : vector<2x8x8xf32>
    %98 = math.exp %97 : vector<2x8x8xf32>
    %cst_31 = arith.constant dense<0.000000e+00> : vector<2x8xf32>
    %99 = vector.multi_reduction <add>, %98, %cst_31 [2] : vector<2x8x8xf32> to vector<2x8xf32>
    %100 = vector.shape_cast %99 : vector<2x8xf32> to vector<2x8x1xf32>
    %101 = tpu.reciprocal %100 : vector<2x8x1xf32> -> vector<2x8x1xf32>
    %102 = vector.broadcast %101 : vector<2x8x1xf32> to vector<2x8x8xf32>
    %103 = arith.mulf %98, %102 : vector<2x8x8xf32>
    %104 = math.exp %103 : vector<2x8x8xf32>
    %cst_32 = arith.constant dense<0.000000e+00> : vector<2x8xf32>
    %105 = vector.multi_reduction <add>, %104, %cst_32 [2] : vector<2x8x8xf32> to vector<2x8xf32>
    %106 = vector.shape_cast %105 : vector<2x8xf32> to vector<2x8x1xf32>
    %107 = tpu.reciprocal %106 : vector<2x8x1xf32> -> vector<2x8x1xf32>
    %108 = vector.broadcast %107 : vector<2x8x1xf32> to vector<2x8x8xf32>
    %109 = arith.mulf %104, %108 : vector<2x8x8xf32>
    %cst_33 = arith.constant dense<0.000000e+00> : vector<2x8x8xf32>
    %110 = tpu.matmul %109, %92, %cst_33 {dimension_numbers = #tpu.dot_dimension_numbers<[2], [1], [1], [2], [0, 0, 0, 1, 1, 2], [0], [0]>} : vector<2x8x8xf32>, vector<2x8x8xf32>, vector<2x8x8xf32> -> vector<2x8x8xf32>
    %c0_34 = arith.constant 0 : index
    %c0_35 = arith.constant 0 : index
    %c24 = arith.constant 24 : index
    %111 = vector.load %arg7[%c0_34, %c0_35, %c24] : memref<2x8x32xf32, #tpu.memory_space<vmem>>, vector<2x8x8xf32>
    tpu.vector_store %arg7[%c0_34, %c0_35, %c24], %110 {strides = array<i32>} : memref<2x8x32xf32, #tpu.memory_space<vmem>>, vector<2x8x8xf32>,
    %c0_36 = arith.constant 0 : index
    %c0_37 = arith.constant 0 : index
    %c0_38 = arith.constant 0 : index
    %112 = vector.load %arg7[%c0_36, %c0_37, %c0_38] : memref<2x8x32xf32, #tpu.memory_space<vmem>>, vector<2x8x32xf32>
    %113 = vector.shape_cast %112 : vector<2x8x32xf32> to vector<16x32xf32>
    %c0_39 = arith.constant 0 : index
    %c0_40 = arith.constant 0 : index
    %114 = vector.load %arg4[%c0_39, %c0_40] : memref<32x32xf32, #tpu.memory_space<vmem>>, vector<32x32xf32>
    %cst_41 = arith.constant dense<0.000000e+00> : vector<16x32xf32>
    %115 = tpu.matmul %113, %114, %cst_41 {dimension_numbers = #tpu.dot_dimension_numbers<[1], [0], [0], [1], [0, 0, 1, 1], [], []>} : vector<16x32xf32>, vector<32x32xf32>, vector<16x32xf32> -> vector<16x32xf32>
    %c0_42 = arith.constant 0 : index
    %c0_43 = arith.constant 0 : index
    %116 = vector.load %arg5[%c0_42, %c0_43] : memref<1x32xf32, #tpu.memory_space<vmem>>, vector<1x32xf32>
    %117 = vector.broadcast %116 : vector<1x32xf32> to vector<16x32xf32>
    %118 = arith.addf %115, %117 : vector<16x32xf32>
    %119 = vector.shape_cast %118 : vector<16x32xf32> to vector<2x8x32xf32>
    %c0_44 = arith.constant 0 : index
    %c0_45 = arith.constant 0 : index
    %c0_46 = arith.constant 0 : index
    %120 = vector.load %arg6[%c0_44, %c0_45, %c0_46] : memref<2x8x32xf32, #tpu.memory_space<vmem>>, vector<2x8x32xf32>
    tpu.vector_store %arg6[%c0_44, %c0_45, %c0_46], %119 {strides = array<i32>} : memref<2x8x32xf32, #tpu.memory_space<vmem>>, vector<2x8x32xf32>,
    return
  }
  func.func @transform_0(%arg0: i32) -> (i32, i32, i32) {
    %c0_i32 = arith.constant 0 : i32
    %c0_i32_0 = arith.constant 0 : i32
    %c0_i32_1 = arith.constant 0 : i32
    return %arg0, %c0_i32, %c0_i32_0 : i32, i32, i32
  }
  func.func @transform_1(%arg0: i32) -> (i32, i32) {
    %c0_i32 = arith.constant 0 : i32
    %c0_i32_0 = arith.constant 0 : i32
    %c0_i32_1 = arith.constant 0 : i32
    return %c0_i32, %c0_i32_0 : i32, i32
  }
  func.func @transform_2(%arg0: i32) -> (i32, i32) {
    %c0_i32 = arith.constant 0 : i32
    %c0_i32_0 = arith.constant 0 : i32
    %c0_i32_1 = arith.constant 0 : i32
    return %c0_i32, %c0_i32_0 : i32, i32
  }
  func.func @transform_3(%arg0: i32) -> (i32, i32) {
    %c0_i32 = arith.constant 0 : i32
    %c0_i32_0 = arith.constant 0 : i32
    %c0_i32_1 = arith.constant 0 : i32
    return %c0_i32, %c0_i32_0 : i32, i32
  }
  func.func @transform_4(%arg0: i32) -> (i32, i32) {
    %c0_i32 = arith.constant 0 : i32
    %c0_i32_0 = arith.constant 0 : i32
    %c0_i32_1 = arith.constant 0 : i32
    return %c0_i32, %c0_i32_0 : i32, i32
  }
  func.func @transform_5(%arg0: i32) -> (i32, i32, i32) {
    %c0_i32 = arith.constant 0 : i32
    %c0_i32_0 = arith.constant 0 : i32
    %c0_i32_1 = arith.constant 0 : i32
    return %arg0, %c0_i32, %c0_i32_0 : i32, i32, i32
  }
}

</mosaic_0001>

<bundles_post_ra>
// kernel: tpu_custom_call.1
= control target key start
LH: loop header
LB: loop body
LE: loop exit
PB: predicated region body
PF: predicated region fallthrough
CT: control target
= control target key end

     0   :  { %10 = vsyncpa [#allocation4], 0  ;;  %s2328_s0 = inlined_call_operand.hbm [shape: f32[2,8,32], index: 0, kind: input, shape index: {}]   ;;  %s2329_s1 = inlined_call_operand.hbm [shape: f32[32,96], index: 1, kind: input, shape index: {}]   ;;  %s2330_s2 = inlined_call_operand.vmem [shape: f32[1,96], index: 2, kind: input, shape index: {}]   ;;  %s2331_s3 = inlined_call_operand.hbm [shape: f32[32,32], index: 3, kind: input, shape index: {}]   ;;  %s2332_s4 = inlined_call_operand.vmem [shape: f32[1,32], index: 4, kind: input, shape index: {}]   ;;  %s2333_s5 = inlined_call_operand.hbm [shape: f32[2,8,32], index: 5, kind: output, shape index: {}]  }
   0x1   :  { %11 = vsyncpa [#allocation7], 0 }
   0x2   :  { %12 = vsyncpa [#allocation5], 0  ;;  %s2056_s18 = smov [#allocation6]   ;;  %s2057_s20 = smov [#allocation3]  }
   0x3   :  { %s30_s19 = sshll.u32 %s2056_s18, 4  ;;  %s18_s21 = sshll.u32 %s2057_s20, 4  ;;  %s31_s19 = int_to_ptr.vmem [resolvable:$true] %s30_s19  ;;  %s2107_s21 = int_to_ptr.vmem [resolvable:$true] %s18_s21 }
   0x4   :  { %s1962_s24 = scalar_lea.hbm %s2329_s1, 512 }
   0x5   :  { %p1963_p0 = scmp.ne.s32.totalorder %s2329_s1, %s1962_s24  ;;  %p1966_p1 = scmp.lt.u32.totalorder %s1962_s24, %s2329_s1 }
   0x7   :  { %p1968_p2 = pnand %p1966_p1, %p1963_p0 }
   0x9   :  { %1971 = shalt.err (!%p1968_p2)
}
   0xa   :  { %s1972_s29 = scalar_lea.vmem %s31_s19, 512  ;;  %p1977_p4 = scmp.lt.s32.totalorder %s31_s19, %s31_s19 }
   0xb   :  { %p1973_p3 = scmp.ne.s32.totalorder %s31_s19, %s1972_s29  ;;  %p1978_p5 = scmp.lt.s32.totalorder %s1972_s29, %s1972_s29 }
   0xd   :  { %p1979_p6 = por %p1978_p5, %p1977_p4 }
   0xf   :  { %p1980_p7 = pnand %p1979_p6, %p1973_p3 }
  0x11   :  { %1983 = shalt.err (!%p1980_p7)
}
  0x12   :  { %s2058_s30 = smov 128   ;;  %s2059_s6 = smov 8  }
  0x13   :  { %36 = dma.hbm_to_vmem [thread:$0]  %s2329_s1, 512, %s31_s19, [#allocation7], %s2058_s30, %s2058_s30, %s2059_s6  }
  0x14   :  { %s1984_s11 = scalar_lea.hbm %s2328_s0, 256 }
  0x15   :  { %p1985_p8 = scmp.ne.s32.totalorder %s2328_s0, %s1984_s11  ;;  %p1988_p9 = scmp.lt.u32.totalorder %s1984_s11, %s2328_s0 }
  0x17   :  { %p1990_p10 = pnand %p1988_p9, %p1985_p8 }
  0x19   :  { %1993 = shalt.err (!%p1990_p10)
}
  0x1a   :  { %s1994_s16 = scalar_lea.vmem %s2107_s21, 256  ;;  %p1999_p12 = scmp.lt.s32.totalorder %s2107_s21, %s2107_s21 }
  0x1b   :  { %p1995_p11 = scmp.ne.s32.totalorder %s2107_s21, %s1994_s16  ;;  %p2000_p13 = scmp.lt.s32.totalorder %s1994_s16, %s1994_s16 }
  0x1d   :  { %p2001_p0 = por %p2000_p13, %p1999_p12 }
  0x1f   :  { %p2002_p1 = pnand %p2001_p0, %p1995_p11 }
  0x21   :  { %2005 = shalt.err (!%p2002_p1)
}
  0x22   :  { %24 = dma.hbm_to_vmem [thread:$0]  %s2328_s0, 256, %s2107_s21, [#allocation4], %s2058_s30, %s2058_s30, %s2059_s6  }
  0x23   :  { %s2060_s18 = smov [#allocation8]   ;;  %s2006_s23 = scalar_lea.hbm %s2331_s3, 512 }
  0x24   :  { %s44_s19 = sshll.u32 %s2060_s18, 4  ;;  %p2007_p2 = scmp.ne.s32.totalorder %s2331_s3, %s2006_s23  ;;  %s45_s19 = int_to_ptr.vmem [resolvable:$true] %s44_s19 }
  0x25   :  { %p2010_p3 = scmp.lt.u32.totalorder %s2006_s23, %s2331_s3 }
  0x27   :  { %p2012_p4 = pnand %p2010_p3, %p2007_p2 }
  0x29   :  { %2015 = shalt.err (!%p2012_p4)
}
  0x2a   :  { %s2016_s28 = scalar_lea.vmem %s45_s19, 512  ;;  %p2021_p6 = scmp.lt.s32.totalorder %s45_s19, %s45_s19 }
  0x2b   :  { %p2017_p5 = scmp.ne.s32.totalorder %s45_s19, %s2016_s28  ;;  %p2022_p7 = scmp.lt.s32.totalorder %s2016_s28, %s2016_s28 }
  0x2d   :  { %p2023_p8 = por %p2022_p7, %p2021_p6 }
  0x2f   :  { %p2024_p9 = pnand %p2023_p8, %p2017_p5 }
  0x31   :  { %2027 = shalt.err (!%p2024_p9)
}
  0x32   :  { %50 = dma.hbm_to_vmem [thread:$0]  %s2331_s3, 512, %s45_s19, [#allocation7], %s2058_s30, %s2058_s30, %s2059_s6  }
  0x33   :  { %2050 = dma.done.wait [#allocation4], 256  }
  0x34   :  { %2051 = vsyncadd [#allocation4], 4294967040 }
  0x35   :  { %2052 = dma.done.wait [#allocation7], 1024  }
  0x36   :  { %2053 = vsyncadd [#allocation7], 4294966272  ;;  %vm75_vm0 = vcmask 261120   ;;  %v64_v0 = vld [vmem:[#allocation6] sm:$0xff]  ;;  %v65_v1 = vld [vmem:[#allocation6 + $0x8] sm:$0xff]  ;;  %v2061_v8 = vmov 0.0  }
  0x37   :  { %v66_v2 = vld [vmem:[#allocation6 + $0x10] sm:$0xff]  ;;  %v1861_v3 = vpack.c.bf16 %v65_v1, %v64_v0  ;;  %v67_v4 = vld [vmem:[#allocation6 + $0x18] sm:$0xff]  ;;  %1770 = vmatprep.subr.mxu1 %v2061_v8  ;;  %vm2062_vm1 = vmmov 0   ;;  %v1685_v9 = vld [vmem:[%s2330_s2] ss:$0 sm:$0xff]  ;;  %s2063_s7 = smov 96  }
  0x38   :  { %v62_v5 = vld [vmem:[#allocation3] sm:$0xff]  ;;  %v1865_v6 = vpack.c.bf16 %v67_v4, %v66_v2  ;;  %v63_v7 = vld [vmem:[#allocation3 + $0x8] sm:$0xff]  ;;  %1772 = vmatprep.mubr.msk.f32.mxu1 %vm2062_vm1, %v2061_v8  ;;  %vm162_vm2 = vcmask 64512   ;;  %s2064_s2 = smov 64   ;;  %s2065_s8 = smov 88   ;;  %vm858_vm3 = vcmask 130112  }
  0x39   :  { %1767 = vmatprep.mubr.msk.f32.mxu0 %vm75_vm0, %v62_v5  ;;  %1862 = vmatprep.subr.bf16.mxu0 %v1861_v3  ;;  %s2066_s9 = smov 120   ;;  %s2067_s10 = smov 56   ;;  %vm1213_vm4 = vcmask 195712   ;;  %vm1568_vm5 = vcmask 261312  }
  0x3a   :  { %1864 = vmatpush3.bf16.msra.mxu0 %v1861_v3  ;;  %s2068_s11 = smov 80   ;;  %s2069_s12 = smov 112  }
  0x3b   :  { %1866 = vmatprep.subr.bf16.mxu0 %v1865_v6  ;;  %s2070_s13 = smov 48   ;;  %s2071_s14 = smov 72  }
  0x3c   :  { %s2072_s15 = smov 104   ;;  %s2073_s16 = smov 40  }
  0x3d   :  { %s2074_s1 = smov 16   ;;  %s2075_s17 = smov 24  }
  0x3e   :  { %1868 = vmatpush3.bf16.msra.mxu0 %v1865_v6  ;;  %s2076_s20 = smov [#allocation9]  }
  0x3f   :  { %1790 = vmatprep.subr.mxu0 %v2061_v8  ;;  %s1672_s22 = sshll.u32 %s2076_s20, 4  ;;  %s1673_s22 = int_to_ptr.vmem [resolvable:$true] %s1672_s22 }
  0x40   :  { %s2028_s23 = scalar_lea.vmem %s1673_s22, 256  ;;  %p2033_p11 = scmp.lt.s32.totalorder %s1673_s22, %s1673_s22 }
  0x41   :  { %1768 = vmatmul.mubr.msk.f32.vlgmr.msra.gmra.mrb[0].mxu0 %vm75_vm0, %v63_v7  ;;  %p2029_p10 = scmp.ne.s32.totalorder %s1673_s22, %s2028_s23  ;;  %p2034_p12 = scmp.lt.s32.totalorder %s2028_s23, %s2028_s23 }
  0x42   :  { %1792 = vmatprep.mubr.msk.f32.mxu0 %vm2062_vm1, %v2061_v8 }
  0x43   :  { %p2035_p13 = por %p2034_p12, %p2033_p11 }
  0x45   :  { %p2036_p0 = pnand %p2035_p13, %p2029_p10 }
 0x114   :  { %v1769_v10 = vpop.f32.mrb[0].mxu0 }
 0x115   :  { %v148_v11 = vpop.f32.mrb[1].mxu0  ;;  %v2173_v13 = vadd.f32 %v1769_v10, %v1685_v9 }
 0x116   :  { %v2170_v12 = vadd.f32 %v1685_v9, %v148_v11 }
 0x117   :  { %v2187_v17 = vmul.f32 5.656854, %v2173_v13 }
 0x118   :  { %160 = vrot.lane.b32.xlu0 %v2170_v12, %s2063_s7  ;;  %v2179_v15 = vmul.f32 5.656854, %v2170_v12 }
 0x11c   :  { %239 = vrot.lane.b32.xlu0 %v2173_v13, %s2063_s7 }
 0x18a   :  { %v161_v14 = vpop.permute.xlu0 %160 }
 0x18b   :  { %1771 = vmatpush3.xpose.msk.msra.mxu1 %vm162_vm2, %v161_v14 }
 0x18c   :  { %1775 = vmatprep.subr.mxu1 %v2061_v8 }
 0x18e   :  { %v240_v16 = vpop.permute.xlu0 %239  ;;  %1773 = vmatmul.mubr.msk.f32.vlgmr.msra.gmra.mrb[0].mxu1 %vm162_vm2, %v2179_v15 }
 0x18f   :  { %1776 = vmatpush3.xpose.msk.msra.mxu1 %vm162_vm2, %v240_v16  ;;  %1777 = vmatprep.mubr.msk.f32.mxu1 %vm2062_vm1, %v2061_v8 }
 0x190   :  { %1780 = vmatprep.subr.mxu1 %v2061_v8 }
 0x192   :  { %1778 = vmatmul.mubr.msk.f32.vlgmr.msra.gmra.mrb[2].mxu1 %vm162_vm2, %v2187_v17 }
 0x193   :  { %1782 = vmatprep.mubr.msk.f32.mxu1 %vm2062_vm1, %v2061_v8 }
 0x261   :  { %v234_v18 = vpop.f32.mrb[0].mxu1 }
 0x262   :  { %v1774_v19 = vpop.f32.mrb[1].mxu1  ;;  %v316_v20 = vsel %vm162_vm2, %v234_v18, -inf }
 0x263   :  { %317 = vmax.xlane.f32.xlu1 %v316_v20 }
 0x265   :  { %v312_v21 = vpop.f32.mrb[2].mxu1 }
 0x266   :  { %v1779_v22 = vpop.f32.mrb[3].mxu1  ;;  %v319_v23 = vsel %vm162_vm2, %v312_v21, -inf }
 0x267   :  { %320 = vmax.xlane.f32.xlu1 %v319_v23 }
 0x2f0   :  { %v318_v24 = vpop.xlane.xlu1 %317 }
 0x2f1   :  { %v322_v25 = vsub.f32 %v234_v18, %v318_v24 }
 0x2f3   :  { %v324_v26 = vmul.f32 1.442695, %v322_v25 }
 0x2f4   :  { %v321_v27 = vpop.xlane.xlu1 %320 }
 0x2f5   :  { %1898 = vpow2.f32 %v324_v26  ;;  %v323_v28 = vsub.f32 %v312_v21, %v321_v27 }
 0x2f7   :  { %v326_v29 = vmul.f32 1.442695, %v323_v28 }
 0x2f9   :  { %1900 = vpow2.f32 %v326_v29 }
 0x2ff   :  { %v1899_v30 = vpop.eup %1898 }
 0x300   :  { %v328_v31 = vsel %vm162_vm2, %v1899_v30, 0.0 }
 0x301   :  { %329 = vadd.xlane.f32.xlu0 %v328_v31 }
 0x303   :  { %v1901_v32 = vpop.eup %1900 }
 0x304   :  { %v331_v33 = vsel %vm162_vm2, %v1901_v32, 0.0 }
 0x305   :  { %332 = vadd.xlane.f32.xlu1 %v331_v33 }
 0x316   :  { %352 = vrot.lane.b32.xlu1 %v2170_v12, %s2064_s2 }
 0x317   :  { %508 = vrot.lane.b32.xlu0 %v2170_v12, %s2065_s8 }
 0x31a   :  { %428 = vrot.lane.b32.xlu1 %v2173_v13, %s2064_s2 }
 0x31e   :  { %586 = vrot.lane.b32.xlu1 %v2173_v13, %s2065_s8 }
 0x322   :  { %506 = vrot.lane.b32.xlu1 %v2179_v15, %s2066_s9 }
 0x38e   :  { %v330_v34 = vpop.xlane.xlu0 %329 }
 0x38f   :  { %1902 = vrcp.f32 %v330_v34 }
 0x392   :  { %v509_v35 = vpop.permute.xlu0 %508  ;;  %v333_v36 = vpop.xlane.xlu1 %332 }
 0x393   :  { %1904 = vrcp.f32 %v333_v36  ;;  %1791 = vmatpush3.xpose.msk.msra.mxu0 %vm162_vm2, %v509_v35 }
 0x394   :  { %1800 = vmatprep.subr.mxu0 %v2061_v8 }
 0x396   :  { %v353_v37 = vpop.permute.xlu1 %352 }
 0x397   :  { %1781 = vmatpush3.msra.mxu1 %v353_v37 }
 0x398   :  { %1785 = vmatprep.subr.mxu1 %v2061_v8 }
 0x399   :  { %v1903_v38 = vpop.eup %1902 }
 0x39a   :  { %v336_v39 = vmul.f32 %v1903_v38, %v1899_v30  ;;  %v429_v40 = vpop.permute.xlu1 %428 }
 0x39c   :  { %v338_v41 = vmul.f32 1.442695, %v336_v39 }
 0x39d   :  { %v1905_v42 = vpop.eup %1904 }
 0x39e   :  { %v337_v43 = vmul.f32 %v1905_v42, %v1901_v32  ;;  %v587_v44 = vpop.permute.xlu1 %586  ;;  %1906 = vpow2.f32 %v338_v41 }
 0x3a0   :  { %v340_v45 = vmul.f32 1.442695, %v337_v43 }
 0x3a2   :  { %v507_v46 = vpop.permute.xlu1 %506  ;;  %1908 = vpow2.f32 %v340_v45 }
 0x3a3   :  { %1793 = vmatmul.mubr.msk.f32.vlgmr.msra.gmra.mrb[2].mxu0 %vm162_vm2, %v507_v46 }
 0x3a4   :  { %1802 = vmatprep.mubr.msk.f32.mxu0 %vm2062_vm1, %v2061_v8 }
 0x3a8   :  { %v1907_v47 = vpop.eup %1906 }
 0x3a9   :  { %v342_v48 = vsel %vm162_vm2, %v1907_v47, 0.0 }
 0x3aa   :  { %343 = vadd.xlane.f32.xlu1 %v342_v48 }
 0x3ac   :  { %v1909_v49 = vpop.eup %1908 }
 0x3ad   :  { %v345_v50 = vsel %vm162_vm2, %v1909_v49, 0.0 }
 0x3ae   :  { %346 = vadd.xlane.f32.xlu1 %v345_v50 }
 0x3bf   :  { %584 = vrot.lane.b32.xlu1 %v2187_v17, %s2066_s9 }
 0x437   :  { %v344_v51 = vpop.xlane.xlu1 %343 }
 0x438   :  { %1910 = vrcp.f32 %v344_v51 }
 0x43b   :  { %v347_v52 = vpop.xlane.xlu1 %346 }
 0x43c   :  { %1912 = vrcp.f32 %v347_v52 }
 0x43f   :  { %v585_v57 = vpop.permute.xlu1 %584 }
 0x442   :  { %v1911_v53 = vpop.eup %1910 }
 0x443   :  { %v350_v54 = vmul.f32 %v1911_v53, %v1907_v47 }
 0x445   :  { %1783 = vmatmul.mubr.msk.f32.vlgmr.msra.gmra.mrb[4].mxu1 %vm162_vm2, %v350_v54 }
 0x446   :  { %v1913_v55 = vpop.eup %1912  ;;  %1786 = vmatpush3.msra.mxu1 %v429_v40  ;;  %1787 = vmatprep.mubr.msk.f32.mxu1 %vm2062_vm1, %v2061_v8 }
 0x447   :  { %v351_v56 = vmul.f32 %v1913_v55, %v1909_v49  ;;  %1795 = vmatprep.subr.mxu1 %v2061_v8 }
 0x449   :  { %1788 = vmatmul.mubr.msk.f32.vlgmr.msra.gmra.mrb[6].mxu1 %vm162_vm2, %v351_v56 }
 0x44a   :  { %1797 = vmatprep.mubr.msk.f32.mxu1 %vm2062_vm1, %v2061_v8 }
 0x44d   :  { %1796 = vmatpush3.xpose.msk.msra.mxu1 %vm162_vm2, %v587_v44 }
 0x44e   :  { %1805 = vmatprep.subr.mxu1 %v2061_v8 }
 0x450   :  { %1798 = vmatmul.mubr.msk.f32.vlgmr.msra.gmra.mrb[8].mxu1 %vm162_vm2, %v585_v57 }
 0x451   :  { %1807 = vmatprep.mubr.msk.f32.mxu1 %vm2062_vm1, %v2061_v8 }
 0x476   :  { %v580_v58 = vpop.f32.mrb[2].mxu0 }
 0x477   :  { %v1794_v59 = vpop.f32.mrb[3].mxu0  ;;  %v662_v60 = vsel %vm162_vm2, %v580_v58, -inf }
 0x478   :  { %663 = vmax.xlane.f32.xlu1 %v662_v60 }
 0x505   :  { %v664_v61 = vpop.xlane.xlu1 %663 }
 0x506   :  { %v668_v62 = vsub.f32 %v580_v58, %v664_v61 }
 0x508   :  { %v670_v63 = vmul.f32 1.442695, %v668_v62 }
 0x50a   :  { %1914 = vpow2.f32 %v670_v63 }
 0x514   :  { %v1915_v0 = vpop.eup %1914 }
 0x515   :  { %v674_v1 = vsel %vm162_vm2, %v1915_v0, 0.0 }
 0x516   :  { %675 = vadd.xlane.f32.xlu1 %v674_v1 }
 0x518   :  { %v424_v2 = vpop.f32.mrb[4].mxu1 }
 0x519   :  { %504 = vst.msk [vmem:[#allocation2] sm:$0xff] %vm162_vm2, %v424_v2  ;;  %v1784_v3 = vpop.f32.mrb[5].mxu1 }
 0x51c   :  { %v500_v4 = vpop.f32.mrb[6].mxu1 }
 0x51d   :  { %505 = vst.msk [vmem:[#allocation2 + $0x8] sm:$0xff] %vm162_vm2, %v500_v4  ;;  %v1789_v5 = vpop.f32.mrb[7].mxu1 }
 0x523   :  { %v658_v6 = vpop.f32.mrb[8].mxu1 }
 0x524   :  { %v1799_v7 = vpop.f32.mrb[9].mxu1  ;;  %v665_v9 = vsel %vm162_vm2, %v658_v6, -inf }
 0x525   :  { %666 = vmax.xlane.f32.xlu0 %v665_v9 }
 0x5a3   :  { %v676_v10 = vpop.xlane.xlu1 %675 }
 0x5a4   :  { %1916 = vrcp.f32 %v676_v10 }
 0x5ae   :  { %v1917_v11 = vpop.eup %1916 }
 0x5af   :  { %v682_v14 = vmul.f32 %v1917_v11, %v1915_v0 }
 0x5b1   :  { %v684_v16 = vmul.f32 1.442695, %v682_v14 }
 0x5b2   :  { %v667_v18 = vpop.xlane.xlu0 %666 }
 0x5b3   :  { %v669_v19 = vsub.f32 %v658_v6, %v667_v18  ;;  %1918 = vpow2.f32 %v684_v16 }
 0x5b5   :  { %v672_v20 = vmul.f32 1.442695, %v669_v19 }
 0x5b7   :  { %1920 = vpow2.f32 %v672_v20 }
 0x5bd   :  { %v1919_v21 = vpop.eup %1918 }
 0x5be   :  { %v688_v22 = vsel %vm162_vm2, %v1919_v21, 0.0 }
 0x5bf   :  { %689 = vadd.xlane.f32.xlu1 %v688_v22 }
 0x5c1   :  { %v1921_v23 = vpop.eup %1920 }
 0x5c2   :  { %v677_v24 = vsel %vm162_vm2, %v1921_v23, 0.0 }
 0x5c3   :  { %678 = vadd.xlane.f32.xlu0 %v677_v24 }
 0x5d0   :  { %698 = vrot.lane.b32.xlu1 %v2170_v12, %s2067_s10 }
 0x5d4   :  { %863 = vrot.lane.b32.xlu1 %v2170_v12, %s2068_s11 }
 0x5d8   :  { %941 = vrot.lane.b32.xlu1 %v2173_v13, %s2068_s11 }
 0x5d9   :  { %774 = vrot.lane.b32.xlu0 %v2173_v13, %s2067_s10 }
 0x5dc   :  { %939 = vrot.lane.b32.xlu1 %v2187_v17, %s2069_s12 }
 0x64c   :  { %v690_v25 = vpop.xlane.xlu1 %689 }
 0x64d   :  { %1922 = vrcp.f32 %v690_v25 }
 0x650   :  { %v679_v26 = vpop.xlane.xlu0 %678  ;;  %v699_v27 = vpop.permute.xlu1 %698 }
 0x651   :  { %1924 = vrcp.f32 %v679_v26  ;;  %1801 = vmatpush3.msra.mxu0 %v699_v27 }
 0x652   :  { %1810 = vmatprep.subr.mxu0 %v2061_v8 }
 0x654   :  { %v775_v28 = vpop.permute.xlu0 %774  ;;  %v864_v31 = vpop.permute.xlu1 %863 }
 0x655   :  { %1806 = vmatpush3.msra.mxu1 %v775_v28 }
 0x656   :  { %1815 = vmatprep.subr.mxu1 %v2061_v8 }
 0x657   :  { %v1923_v29 = vpop.eup %1922 }
 0x658   :  { %v696_v30 = vmul.f32 %v1923_v29, %v1919_v21  ;;  %v942_v40 = vpop.permute.xlu1 %941 }
 0x65a   :  { %1803 = vmatmul.mubr.msk.f32.vlgmr.msra.gmra.mrb[4].mxu0 %vm162_vm2, %v696_v30 }
 0x65b   :  { %v1925_v32 = vpop.eup %1924  ;;  %1811 = vmatpush3.xpose.msk.msra.mxu0 %vm162_vm2, %v864_v31  ;;  %1812 = vmatprep.mubr.msk.f32.mxu0 %vm2062_vm1, %v2061_v8 }
 0x65c   :  { %v683_v33 = vmul.f32 %v1925_v32, %v1921_v23  ;;  %1820 = vmatprep.subr.mxu0 %v2061_v8  ;;  %v940_v42 = vpop.permute.xlu1 %939 }
 0x65e   :  { %v686_v34 = vmul.f32 1.442695, %v683_v33 }
 0x660   :  { %1926 = vpow2.f32 %v686_v34 }
 0x66a   :  { %v1927_v35 = vpop.eup %1926 }
 0x66b   :  { %v691_v36 = vsel %vm162_vm2, %v1927_v35, 0.0 }
 0x66c   :  { %692 = vadd.xlane.f32.xlu0 %v691_v36 }
 0x682   :  { %861 = vrot.lane.b32.xlu0 %v2179_v15, %s2069_s12 }
 0x6f9   :  { %v693_v37 = vpop.xlane.xlu0 %692 }
 0x6fa   :  { %1928 = vrcp.f32 %v693_v37 }
 0x6fd   :  { %v862_v38 = vpop.permute.xlu0 %861 }
 0x6fe   :  { %1813 = vmatmul.mubr.msk.f32.vlgmr.msra.gmra.mrb[6].mxu0 %vm162_vm2, %v862_v38 }
 0x6ff   :  { %1822 = vmatprep.mubr.msk.f32.mxu0 %vm2062_vm1, %v2061_v8 }
 0x704   :  { %v1929_v39 = vpop.eup %1928 }
 0x705   :  { %v697_v41 = vmul.f32 %v1929_v39, %v1927_v35 }
 0x707   :  { %1808 = vmatmul.mubr.msk.f32.vlgmr.msra.gmra.mrb[10].mxu1 %vm162_vm2, %v697_v41 }
 0x708   :  { %1816 = vmatpush3.xpose.msk.msra.mxu1 %vm162_vm2, %v942_v40  ;;  %1817 = vmatprep.mubr.msk.f32.mxu1 %vm2062_vm1, %v2061_v8 }
 0x709   :  { %1825 = vmatprep.subr.mxu1 %v2061_v8 }
 0x70b   :  { %1818 = vmatmul.mubr.msk.f32.vlgmr.msra.gmra.mrb[12].mxu1 %vm162_vm2, %v940_v42 }
 0x70c   :  { %1827 = vmatprep.mubr.msk.f32.mxu1 %vm2062_vm1, %v2061_v8 }
 0x72d   :  { %v2258_v43 = vpop.f32.mrb[4].mxu0 }
 0x72e   :  { %v1804_v44 = vpop.f32.mrb[5].mxu0 }
 0x7d1   :  { %v935_v45 = vpop.f32.mrb[6].mxu0 }
 0x7d2   :  { %v1814_v46 = vpop.f32.mrb[7].mxu0  ;;  %v1017_v47 = vsel %vm162_vm2, %v935_v45, -inf }
 0x7d3   :  { %1018 = vmax.xlane.f32.xlu0 %v1017_v47 }
 0x7da   :  { %v2261_v48 = vpop.f32.mrb[10].mxu1 }
 0x7db   :  { %v1809_v49 = vpop.f32.mrb[11].mxu1 }
 0x7de   :  { %v1013_v50 = vpop.f32.mrb[12].mxu1 }
 0x7df   :  { %v1819_v51 = vpop.f32.mrb[13].mxu1  ;;  %v1020_v52 = vsel %vm162_vm2, %v1013_v50, -inf }
 0x7e0   :  { %1021 = vmax.xlane.f32.xlu1 %v1020_v52 }
 0x860   :  { %v1019_v53 = vpop.xlane.xlu0 %1018 }
 0x861   :  { %v1023_v54 = vsub.f32 %v935_v45, %v1019_v53 }
 0x863   :  { %v1025_v55 = vmul.f32 1.442695, %v1023_v54 }
 0x865   :  { %1930 = vpow2.f32 %v1025_v55 }
 0x86d   :  { %v1022_v56 = vpop.xlane.xlu1 %1021 }
 0x86e   :  { %v1024_v57 = vsub.f32 %v1013_v50, %v1022_v56 }
 0x86f   :  { %v1931_v58 = vpop.eup %1930 }
 0x870   :  { %v1027_v59 = vmul.f32 1.442695, %v1024_v57  ;;  %v1029_v60 = vsel %vm162_vm2, %v1931_v58, 0.0 }
 0x871   :  { %1030 = vadd.xlane.f32.xlu0 %v1029_v60 }
 0x872   :  { %1932 = vpow2.f32 %v1027_v59 }
 0x87c   :  { %v1933_v61 = vpop.eup %1932 }
 0x87d   :  { %v1032_v62 = vsel %vm162_vm2, %v1933_v61, 0.0 }
 0x87e   :  { %1033 = vadd.xlane.f32.xlu0 %v1032_v62 }
 0x894   :  { %1129 = vrot.lane.b32.xlu0 %v2173_v13, %s2070_s13 }
 0x8fe   :  { %v1031_v63 = vpop.xlane.xlu0 %1030 }
 0x8ff   :  { %1934 = vrcp.f32 %v1031_v63 }
 0x909   :  { %v1935_v0 = vpop.eup %1934 }
 0x90a   :  { %v1037_v1 = vmul.f32 %v1935_v0, %v1931_v58 }
 0x90b   :  { %v1034_v2 = vpop.xlane.xlu0 %1033 }
 0x90c   :  { %1936 = vrcp.f32 %v1034_v2  ;;  %v1039_v3 = vmul.f32 1.442695, %v1037_v1 }
 0x90e   :  { %1938 = vpow2.f32 %v1039_v3  ;;  %v1573_v3 = vld [vmem:[#allocation8] sm:$0xff] }
 0x90f   :  { %v1130_v4 = vpop.permute.xlu0 %1129 }
 0x910   :  { %1826 = vmatpush3.msra.mxu1 %v1130_v4  ;;  %v1574_v4 = vld [vmem:[#allocation8 + $0x8] sm:$0xff] }
 0x911   :  { %1835 = vmatprep.subr.mxu1 %v2061_v8 }
 0x916   :  { %v1937_v5 = vpop.eup %1936 }
 0x917   :  { %v1038_v6 = vmul.f32 %v1937_v5, %v1933_v61 }
 0x918   :  { %v1939_v7 = vpop.eup %1938 }
 0x919   :  { %v1043_v9 = vsel %vm162_vm2, %v1939_v7, 0.0  ;;  %v1041_v10 = vmul.f32 1.442695, %v1038_v6  ;;  %v1869_v6 = vpack.c.bf16 %v1574_v4, %v1573_v3 }
 0x91a   :  { %1044 = vadd.xlane.f32.xlu1 %v1043_v9  ;;  %v1575_v9 = vld [vmem:[#allocation8 + $0x10] sm:$0xff] }
 0x91b   :  { %1940 = vpow2.f32 %v1041_v10  ;;  %v1576_v10 = vld [vmem:[#allocation8 + $0x18] sm:$0xff] }
 0x925   :  { %v1941_v11 = vpop.eup %1940 }
 0x926   :  { %v1046_v14 = vsel %vm162_vm2, %v1941_v11, 0.0 }
 0x927   :  { %1047 = vadd.xlane.f32.xlu0 %v1046_v14 }
 0x92b   :  { %1053 = vrot.lane.b32.xlu1 %v2170_v12, %s2070_s13 }
 0x92f   :  { %1218 = vrot.lane.b32.xlu1 %v2170_v12, %s2071_s14 }
 0x933   :  { %1296 = vrot.lane.b32.xlu1 %v2173_v13, %s2071_s14 }
 0x937   :  { %1294 = vrot.lane.b32.xlu1 %v2187_v17, %s2072_s15 }
 0x93d   :  { %1216 = vrot.lane.b32.xlu0 %v2179_v15, %s2072_s15 }
 0x9a7   :  { %v1045_v16 = vpop.xlane.xlu1 %1044 }
 0x9a8   :  { %1942 = vrcp.f32 %v1045_v16 }
 0x9ab   :  { %v1054_v18 = vpop.permute.xlu1 %1053 }
 0x9ac   :  { %1821 = vmatpush3.msra.mxu0 %v1054_v18 }
 0x9ad   :  { %1830 = vmatprep.subr.mxu0 %v2061_v8 }
 0x9af   :  { %v1219_v22 = vpop.permute.xlu1 %1218 }
 0x9b2   :  { %v1943_v19 = vpop.eup %1942 }
 0x9b3   :  { %v1051_v20 = vmul.f32 %v1943_v19, %v1939_v7  ;;  %v1297_v23 = vpop.permute.xlu1 %1296 }
 0x9b4   :  { %v1048_v21 = vpop.xlane.xlu0 %1047 }
 0x9b5   :  { %1944 = vrcp.f32 %v1048_v21  ;;  %1823 = vmatmul.mubr.msk.f32.vlgmr.msra.gmra.mrb[8].mxu0 %vm162_vm2, %v1051_v20 }
 0x9b6   :  { %1831 = vmatpush3.xpose.msk.msra.mxu0 %vm162_vm2, %v1219_v22  ;;  %1832 = vmatprep.mubr.msk.f32.mxu0 %vm2062_vm1, %v2061_v8  ;;  %v1712_v22 = vld [vmem:[%s2332_s4] ss:$0 sm:$0xff] }
 0x9b7   :  { %1840 = vmatprep.subr.mxu0 %v2061_v8  ;;  %v1295_v25 = vpop.permute.xlu1 %1294 }
 0x9b8   :  { %v1217_v15 = vpop.permute.xlu0 %1216 }
 0x9b9   :  { %1833 = vmatmul.mubr.msk.f32.vlgmr.msra.gmra.mrb[10].mxu0 %vm162_vm2, %v1217_v15 }
 0x9ba   :  { %1842 = vmatprep.mubr.msk.f32.mxu0 %vm2062_vm1, %v2061_v8 }
 0x9bf   :  { %v1945_v17 = vpop.eup %1944 }
 0x9c0   :  { %v1052_v24 = vmul.f32 %v1945_v17, %v1941_v11  ;;  %v1873_v11 = vpack.c.bf16 %v1576_v10, %v1575_v9 }
 0x9c2   :  { %1828 = vmatmul.mubr.msk.f32.vlgmr.msra.gmra.mrb[14].mxu1 %vm162_vm2, %v1052_v24 }
 0x9c3   :  { %1836 = vmatpush3.xpose.msk.msra.mxu1 %vm162_vm2, %v1297_v23  ;;  %1837 = vmatprep.mubr.msk.f32.mxu1 %vm2062_vm1, %v2061_v8 }
 0x9c4   :  { %1845 = vmatprep.subr.mxu1 %v2061_v8 }
 0x9c6   :  { %1838 = vmatmul.mubr.msk.f32.vlgmr.msra.gmra.mrb[16].mxu1 %vm162_vm2, %v1295_v25 }
 0x9c7   :  { %1847 = vmatprep.mubr.msk.f32.mxu1 %vm2062_vm1, %v2061_v8 }
 0xa88   :  { %v1125_v26 = vpop.f32.mrb[8].mxu0 }
 0xa89   :  { %v1824_v27 = vpop.f32.mrb[9].mxu0 }
 0xa8c   :  { %v1290_v28 = vpop.f32.mrb[10].mxu0 }
 0xa8d   :  { %v1834_v29 = vpop.f32.mrb[11].mxu0  ;;  %v1372_v30 = vsel %vm162_vm2, %v1290_v28, -inf }
 0xa8e   :  { %1373 = vmax.xlane.f32.xlu0 %v1372_v30 }
 0xa95   :  { %v1201_v31 = vpop.f32.mrb[14].mxu1 }
 0xa96   :  { %v1829_v32 = vpop.f32.mrb[15].mxu1 }
 0xa99   :  { %v1368_v33 = vpop.f32.mrb[16].mxu1 }
 0xa9a   :  { %v1839_v34 = vpop.f32.mrb[17].mxu1  ;;  %v1375_v35 = vsel %vm162_vm2, %v1368_v33, -inf }
 0xa9b   :  { %1376 = vmax.xlane.f32.xlu1 %v1375_v35 }
 0xb1b   :  { %v1374_v36 = vpop.xlane.xlu0 %1373 }
 0xb1c   :  { %v1378_v37 = vsub.f32 %v1290_v28, %v1374_v36 }
 0xb1e   :  { %v1380_v38 = vmul.f32 1.442695, %v1378_v37 }
 0xb20   :  { %1946 = vpow2.f32 %v1380_v38 }
 0xb28   :  { %v1377_v39 = vpop.xlane.xlu1 %1376 }
 0xb29   :  { %v1379_v8 = vsub.f32 %v1368_v33, %v1377_v39 }
 0xb2a   :  { %v1947_v40 = vpop.eup %1946 }
 0xb2b   :  { %v1382_v41 = vmul.f32 1.442695, %v1379_v8  ;;  %v1384_v42 = vsel %vm162_vm2, %v1947_v40, 0.0 }
 0xb2c   :  { %1385 = vadd.xlane.f32.xlu0 %v1384_v42 }
 0xb2d   :  { %1948 = vpow2.f32 %v1382_v41 }
 0xb37   :  { %v1949_v44 = vpop.eup %1948 }
 0xb38   :  { %v1387_v45 = vsel %vm162_vm2, %v1949_v44, 0.0 }
 0xb39   :  { %1388 = vadd.xlane.f32.xlu0 %v1387_v45 }
 0xbb9   :  { %v1386_v46 = vpop.xlane.xlu0 %1385 }
 0xbba   :  { %1950 = vrcp.f32 %v1386_v46 }
 0xbc4   :  { %v1951_v47 = vpop.eup %1950 }
 0xbc5   :  { %v1392_v49 = vmul.f32 %v1951_v47, %v1947_v40 }
 0xbc6   :  { %v1389_v50 = vpop.xlane.xlu0 %1388 }
 0xbc7   :  { %1952 = vrcp.f32 %v1389_v50  ;;  %v1394_v51 = vmul.f32 1.442695, %v1392_v49 }
 0xbc9   :  { %1954 = vpow2.f32 %v1394_v51 }
 0xbd1   :  { %v1953_v52 = vpop.eup %1952 }
 0xbd2   :  { %v1393_v53 = vmul.f32 %v1953_v52, %v1949_v44 }
 0xbd3   :  { %v1955_v54 = vpop.eup %1954 }
 0xbd4   :  { %v1398_v55 = vsel %vm162_vm2, %v1955_v54, 0.0  ;;  %v1396_v56 = vmul.f32 1.442695, %v1393_v53 }
 0xbd5   :  { %1399 = vadd.xlane.f32.xlu1 %v1398_v55 }
 0xbd6   :  { %1956 = vpow2.f32 %v1396_v56 }
 0xbe0   :  { %v1957_v57 = vpop.eup %1956 }
 0xbe1   :  { %v1401_v58 = vsel %vm162_vm2, %v1957_v57, 0.0 }
 0xbe2   :  { %1402 = vadd.xlane.f32.xlu0 %v1401_v58 }
 0xbe6   :  { %1408 = vrot.lane.b32.xlu1 %v2170_v12, %s2073_s16 }
 0xbea   :  { %852 = vrot.lane.b32.xlu1 %v2258_v43, %s2059_s6 }
 0xbee   :  { %854 = vrot.lane.b32.xlu1 %v2261_v48, %s2059_s6 }
 0xbf2   :  { %1209 = vrot.lane.b32.xlu1 %v1201_v31, %s2074_s1 }
 0xbf8   :  { %1484 = vrot.lane.b32.xlu0 %v2173_v13, %s2073_s16 }
 0xbfc   :  { %1207 = vrot.lane.b32.xlu0 %v1125_v26, %s2074_s1 }
 0xc62   :  { %v1400_v59 = vpop.xlane.xlu1 %1399 }
 0xc63   :  { %1958 = vrcp.f32 %v1400_v59 }
 0xc66   :  { %v1409_v60 = vpop.permute.xlu1 %1408 }
 0xc67   :  { %1841 = vmatpush3.msra.mxu0 %v1409_v60 }
 0xc68   :  { %1870 = vmatprep.subr.bf16.mxu0 %v1869_v6 }
 0xc6a   :  { %v853_v61 = vpop.permute.xlu1 %852 }
 0xc6b   :  { %859 = vst.msk [vmem:[#allocation2] sm:$0xff] %vm858_vm3, %v853_v61 }
 0xc6d   :  { %v1959_v62 = vpop.eup %1958 }
 0xc6e   :  { %v1406_v12 = vmul.f32 %v1959_v62, %v1955_v54  ;;  %v855_v63 = vpop.permute.xlu1 %854 }
 0xc6f   :  { %860 = vst.msk [vmem:[#allocation2 + $0x8] sm:$0xff] %vm858_vm3, %v855_v63  ;;  %v1403_v43 = vpop.xlane.xlu0 %1402 }
 0xc70   :  { %1960 = vrcp.f32 %v1403_v43  ;;  %1843 = vmatmul.mubr.msk.f32.vlgmr.msra.gmra.mrb[12].mxu0 %vm162_vm2, %v1406_v12 }
 0xc71   :  { %1872 = vmatpush3.bf16.msra.mxu0 %v1869_v6 }
 0xc72   :  { %v1210_v48 = vpop.permute.xlu1 %1209  ;;  %1874 = vmatprep.subr.bf16.mxu0 %v1873_v11 }
 0xc73   :  { %1215 = vst.msk [vmem:[#allocation2 + $0x8] sm:$0xff] %vm1213_vm4, %v1210_v48  ;;  %v1485_v13 = vpop.permute.xlu0 %1484 }
 0xc74   :  { %1846 = vmatpush3.msra.mxu1 %v1485_v13 }
 0xc75   :  { %1876 = vmatpush3.bf16.msra.mxu0 %v1873_v11 }
 0xc77   :  { %v1208_v0 = vpop.permute.xlu0 %1207 }
 0xc78   :  { %1214 = vst.msk [vmem:[#allocation2] sm:$0xff] %vm1213_vm4, %v1208_v0 }
 0xc7a   :  { %v1961_v1 = vpop.eup %1960 }
 0xc7b   :  { %v1407_v2 = vmul.f32 %v1961_v1, %v1957_v57 }
 0xc7d   :  { %1848 = vmatmul.mubr.msk.f32.vlgmr.msra.gmra.mrb[18].mxu1 %vm162_vm2, %v1407_v2 }
 0xd43   :  { %v1480_v5 = vpop.f32.mrb[12].mxu0 }
 0xd44   :  { %1562 = vrot.lane.b32.xlu0 %v1480_v5, %s2075_s17  ;;  %v1844_v7 = vpop.f32.mrb[13].mxu0 }
 0xd50   :  { %v1556_v14 = vpop.f32.mrb[18].mxu1 }
 0xd51   :  { %1564 = vrot.lane.b32.xlu1 %v1556_v14, %s2075_s17  ;;  %v1849_v16 = vpop.f32.mrb[19].mxu1 }
 0xdb6   :  { %v1563_v18 = vpop.permute.xlu0 %1562 }
 0xdb7   :  { %1569 = vst.msk [vmem:[#allocation2] sm:$0xff] %vm1568_vm5, %v1563_v18 }
 0xdbe   :  { %v1571_v19 = vld [vmem:[#allocation2] sm:$0xff] }
 0xdbf   :  { %1858 = vmatprep.mubr.msk.f32.mxu0 %vm75_vm0, %v1571_v19 }
 0xdc3   :  { %v1565_v20 = vpop.permute.xlu1 %1564 }
 0xdc4   :  { %1570 = vst.msk [vmem:[#allocation2 + $0x8] sm:$0xff] %vm1568_vm5, %v1565_v20 }
 0xdcb   :  { %v1572_v21 = vld [vmem:[#allocation2 + $0x8] sm:$0xff] }
 0xdcc   :  { %1859 = vmatmul.mubr.msk.f32.vlgmr.msra.gmra.mrb[14].mxu0 %vm75_vm0, %v1572_v21 }
 0xe9f   :  { %v1860_v15 = vpop.f32.mrb[14].mxu0 }
 0xea0   :  { %v1662_v17 = vadd.f32 %v1860_v15, %v1712_v22  ;;  %v1656_v23 = vpop.f32.mrb[15].mxu0 }
 0xea1   :  { %v1657_v24 = vadd.f32 %v1712_v22, %v1656_v23 }
 0xea2   :  { %1666 = vst.msk [vmem:[#allocation9 + $0x8] sm:$0xff] %vm75_vm0, %v1662_v17 }
 0xea3   :  { %1665 = vst.msk [vmem:[#allocation9] sm:$0xff] %vm75_vm0, %v1657_v24 }
 0xea4   :  { %2039 = shalt.err (!%p2036_p0)
}
 0xea5   :  { %s2040_s25 = scalar_lea.hbm %s2333_s5, 256 }
 0xea6   :  { %p2041_p1 = scmp.ne.s32.totalorder %s2333_s5, %s2040_s25  ;;  %p2044_p2 = scmp.lt.u32.totalorder %s2040_s25, %s2333_s5 }
 0xea8   :  { %p2046_p3 = pnand %p2044_p2, %p2041_p1 }
 0xeaa   :  { %2049 = shalt.err (!%p2046_p3)
}
 0xeab   :  { %1678 = dma.vmem_to_hbm [thread:$0]  %s1673_s22, 256, %s2333_s5, [#allocation5], %s2058_s30, %s2058_s30, %s2059_s6  }
 0xeac   :  { %2054 = dma.done.wait [#allocation5], 256  }
 0xead   :  { %2055 = vsyncadd [#allocation5], 4294967040 }
 0xeae   :  { %1682 = vsyncpa [#allocation4], 1 }
 0xeaf   :  { %1683 = vsyncpa [#allocation7], 1 }
 0xeb0   :  { %1684 = vsyncpa [#allocation5], 1 }

</bundles_post_ra>
